<compile_context>
chip_gen: v7x
topology: tpu7x:2x2x1
jax: 0.10.0
libtpu: 0.0.40
codegen_flags: <defaults>
</compile_context>

<pallas_src>
import jax
import jax.numpy as jnp
from jax.experimental import pallas as pl
from jax.experimental.pallas import tpu as pltpu


def _stats_kernel(x_ref, p_ref, g_ref, r_ref, sx_ref, pp_ref, sp_ref):
    """Accumulate per-(batch, split) moments over one N-tile.

    x_ref: (1, C, TN) image channels (native dtype, streamed at input width)
    p_ref: (1, 1, TN) pan channel
    Accumulator outputs (resident across the reduction axis, zeroed at k==0):
      g_ref : (1, 1, C, C)  X X^T
      r_ref : (1, 1, C, 1)  X pan^T
      sx_ref: (1, 1, C, 1)  X 1
      pp_ref: (1, 1, 1, 1)  pan . pan
      sp_ref: (1, 1, 1, 1)  sum(pan)
    """
    x = x_ref[0]                      # [C, TN]
    p = p_ref[0]                      # [1, TN]
    f32 = jnp.float32

    # Gram on the MXU: bf16/f32 operands straight in, f32 accumulation.
    # TODO(synk): if a bundle dump ever shows a materialized XLU transpose of
    # the TN-wide RHS for this A @ A^T contraction, restructure into 256-lane
    # K-chunks (perf-review item); not verifiable from here.
    g = jax.lax.dot_general(x, x, (((1,), (1,)), ((), ())),
                            preferred_element_type=f32)           # [C, C]

    # Cross / mean-correction terms on the VPU-mul + XLU lane-reduce path
    # (those slots are idle while the MXU / DMA run); accumulate in f32.
    r = jnp.sum(x * p, axis=1, keepdims=True, dtype=f32)           # [C, 1]
    sx = jnp.sum(x, axis=1, keepdims=True, dtype=f32)              # [C, 1]
    pp = jnp.sum(p * p, axis=1, keepdims=True, dtype=f32)          # [1, 1]
    sp = jnp.sum(p, axis=1, keepdims=True, dtype=f32)              # [1, 1]

    @pl.when(pl.program_id(2) == 0)
    def _():
        g_ref[...] = jnp.zeros_like(g_ref)
        r_ref[...] = jnp.zeros_like(r_ref)
        sx_ref[...] = jnp.zeros_like(sx_ref)
        pp_ref[...] = jnp.zeros_like(pp_ref)
        sp_ref[...] = jnp.zeros_like(sp_ref)

    g_ref[0, 0] += g
    r_ref[0, 0] += r
    sx_ref[0, 0] += sx
    pp_ref[0, 0] += pp
    sp_ref[0, 0] += sp


def _vmem_capacity_bytes():
    try:
        info = pltpu.get_tpu_info()
        return int(getattr(info, "vmem_capacity_bytes", 64 << 20))
    except Exception:
        return 64 << 20                      # conservative default (v7x VMEM)


def _pick_tn(N, C, itemsize):
    """Largest lane tile that fits the VMEM budget (double-buffered inputs)
    and avoids a wrapper-side jnp.pad whenever possible."""
    vmem_cap = _vmem_capacity_bytes()
    budget = int(vmem_cap * 0.45)            # headroom for outputs / scratch
    tn_max = budget // (2 * (C + 1) * itemsize)
    tn_max = max(128, (tn_max // 128) * 128)

    if N <= tn_max:
        return N, N                          # single full-extent tile, no pad
    best = 0
    if N % 128 == 0:                         # largest 128-aligned divisor of N
        m = N // 128
        i = 1
        while i * i <= m:
            if m % i == 0:
                for cand in (i, m // i):
                    tn = cand * 128
                    if best < tn <= tn_max:
                        best = tn
            i += 1
    if best:
        return best, N
    # Rare fallback (N with no usable 128-aligned divisor): zero-pad.  Zeros
    # contribute nothing to any statistic that is read.
    tn = tn_max
    return tn, pl.cdiv(N, tn) * tn


def lsr_cd(outputs, pan):
    """Pallas implementation of LSR.forward.

    outputs: [B, C, H, W], pan: [B, 1, H, W]  ->  cd: [B]
    """
    B, C, H, W = outputs.shape
    N = H * W
    itemsize = jnp.dtype(outputs.dtype).itemsize
    x = outputs.reshape(B, C, N)
    p = pan.reshape(B, 1, N)

    tn, n_pad = _pick_tn(N, C, itemsize)

    # v7x has 2 TensorCores/chip: when B == 1 the batch axis alone cannot feed
    # both, so make sure the N reduction has an even number of tiles and split
    # it 2-way along a parallel grid axis (partials summed in the wrapper).
    if B == 1 and n_pad == N and (N // tn) == 1 and N % 256 == 0:
        tn = N // 2
    if n_pad != N:
        x = jnp.pad(x, ((0, 0), (0, 0), (0, n_pad - N)))
        p = jnp.pad(p, ((0, 0), (0, 0), (0, n_pad - N)))

    kt_total = n_pad // tn
    split = 2 if (B == 1 and kt_total % 2 == 0 and kt_total >= 2) else 1
    kt = kt_total // split

    def in_map(b, s, k):
        return (b, 0, s * kt + k)

    def out_map(b, s, k):
        return (b, s, 0, 0)

    f32 = jnp.float32
    out_shape = (
        jax.ShapeDtypeStruct((B, split, C, C), f32),
        jax.ShapeDtypeStruct((B, split, C, 1), f32),
        jax.ShapeDtypeStruct((B, split, C, 1), f32),
        jax.ShapeDtypeStruct((B, split, 1, 1), f32),
        jax.ShapeDtypeStruct((B, split, 1, 1), f32),
    )
    out_specs = (
        pl.BlockSpec((1, 1, C, C), out_map),
        pl.BlockSpec((1, 1, C, 1), out_map),
        pl.BlockSpec((1, 1, C, 1), out_map),
        pl.BlockSpec((1, 1, 1, 1), out_map),
        pl.BlockSpec((1, 1, 1, 1), out_map),
    )

    vmem_cap = _vmem_capacity_bytes()
    need = 2 * (C + 1) * tn * itemsize + (8 << 20)
    vmem_limit = int(min(int(vmem_cap * 0.9), max(32 << 20, need)))

    cost = pl.CostEstimate(
        flops=2 * B * (C + 2) * (C + 2) * N,
        transcendentals=0,
        bytes_accessed=B * (C + 1) * N * itemsize
        + B * split * (C * C + 2 * C + 2) * 4,
    )

    g_o, r_o, sx_o, pp_o, sp_o = pl.pallas_call(
        _stats_kernel,
        out_shape=out_shape,
        grid=(B, split, kt),
        in_specs=[pl.BlockSpec((1, C, tn), in_map),
                  pl.BlockSpec((1, 1, tn), in_map)],
        out_specs=out_specs,
        compiler_params=pltpu.CompilerParams(
            dimension_semantics=("parallel", "parallel", "arbitrary"),
            vmem_limit_bytes=vmem_limit),
        cost_estimate=cost,
    )(x, p)

    # --- tiny JAX glue: batched CxC solve + closed-form cd -------------------
    G = jnp.sum(g_o, axis=1)                    # [B, C, C]  = X X^T
    r = jnp.sum(r_o, axis=1)[..., 0]            # [B, C]     = X pan^T
    sx = jnp.sum(sx_o, axis=1)[..., 0]          # [B, C]     = X 1
    pp = jnp.sum(pp_o, axis=1)[:, 0, 0]         # [B]        = pan . pan
    sp = jnp.sum(sp_o, axis=1)[:, 0, 0]         # [B]        = sum(pan)

    # Normal-equation solve (== pinverse for full-rank X) with a tiny relative
    # ridge so the f32 solve stays stable for near-collinear channels.
    tr = jnp.einsum('bii->b', G)                                   # [B]
    lam = (jnp.finfo(jnp.float32).eps * tr / C)[:, None, None]
    alpha = jnp.linalg.solve(G + lam * jnp.eye(C, dtype=G.dtype),
                             r[..., None])[..., 0]                 # [B, C]

    aTr = jnp.sum(alpha * r, axis=-1)                              # [B]
    aTGa = jnp.einsum('bi,bij,bj->b', alpha, G, alpha)             # [B]
    aTsx = jnp.sum(alpha * sx, axis=-1)                            # [B]
    n_f = jnp.float32(N)

    # err = pan - alpha^T X :  sum(err^2) = pp - 2 a'r + a'Ga ; mean-correct.
    # The unbiased-variance (N-1) divisors cancel in the ratio.
    ss_err = pp - 2.0 * aTr + aTGa - (sp - aTsx) ** 2 / n_f
    ss_pan = pp - sp ** 2 / n_f
    # TODO(synk): constant pan gives ss_pan == 0 -> inf/nan, same as torch.
    cd = 1.0 - ss_err / ss_pan
    return cd


if __name__ == "__main__":
    key = jax.random.PRNGKey(0)
    k1, k2, k3 = jax.random.split(key, 3)
    B, C, H, W = 2, 4, 16, 16
    outputs = jax.random.normal(k1, (B, C, H, W), dtype=jnp.float32)
    # make pan correlated with outputs so the regression is meaningful
    true_alpha = jax.random.uniform(k2, (1, C, 1, 1), dtype=jnp.float32)
    pan = jnp.sum(outputs * true_alpha, axis=1, keepdims=True) \
        + 0.1 * jax.random.normal(k3, (B, 1, H, W), dtype=jnp.float32)

    cd = jax.block_until_ready(lsr_cd(outputs, pan))

    # pure-JAX reference (mirrors the torch forward, in f32)
    def ref(outputs, pan):
        Bq, Cq = outputs.shape[:2]
        A = outputs.reshape(Bq, Cq, -1).transpose(0, 2, 1)   # [B, N, C]
        b = pan.reshape(Bq, 1, -1).transpose(0, 2, 1)        # [B, N, 1]
        alpha = jnp.linalg.pinv(A) @ b                        # [B, C, 1]
        i_r = jnp.sum(outputs * alpha[..., None], axis=1, keepdims=True)
        err = pan - i_r
        var = lambda t: jnp.var(t.reshape(Bq, -1), axis=1, ddof=1)
        return 1.0 - var(err) / var(pan)

    cd_ref = ref(outputs, pan)
    assert jnp.allclose(cd, cd_ref, atol=2e-3, rtol=2e-3), (cd, cd_ref)
    print("KERNEL_OK")
</pallas_src>

<mosaic_0001>
module attributes {stable_mosaic.version = 11 : i64} {
  func.func @_stats_kernel(%arg0: i32, %arg1: i32, %arg2: i32, %arg3: memref<1x4x256xf32, #tpu.memory_space<vmem>>, %arg4: memref<1x1x256xf32, #tpu.memory_space<vmem>>, %arg5: memref<1x1x4x4xf32, #tpu.memory_space<vmem>>, %arg6: memref<1x1x4x1xf32, #tpu.memory_space<vmem>>, %arg7: memref<1x1x4x1xf32, #tpu.memory_space<vmem>>, %arg8: memref<1x1x1x1xf32, #tpu.memory_space<vmem>>, %arg9: memref<1x1x1x1xf32, #tpu.memory_space<vmem>>) attributes {dimension_semantics = [#tpu.dimension_semantics<parallel>, #tpu.dimension_semantics<parallel>, #tpu.dimension_semantics<arbitrary>], iteration_bounds = array<i64: 2, 1, 1>, scalar_prefetch = 0 : i64, scratch_operands = 0 : i64, tpu.core_type = #tpu.core_type<tc>, window_params = [{transform_indices = @transform_0, window_bounds = array<i64: 1, 4, 256>}, {transform_indices = @transform_1, window_bounds = array<i64: 1, 1, 256>}, {transform_indices = @transform_2, window_bounds = array<i64: 1, 1, 4, 4>}, {transform_indices = @transform_3, window_bounds = array<i64: 1, 1, 4, 1>}, {transform_indices = @transform_4, window_bounds = array<i64: 1, 1, 4, 1>}, {transform_indices = @transform_5, window_bounds = array<i64: 1, 1, 1, 1>}, {transform_indices = @transform_6, window_bounds = array<i64: 1, 1, 1, 1>}]} {
    %c0 = arith.constant 0 : index
    %c0_0 = arith.constant 0 : index
    %c0_1 = arith.constant 0 : index
    %0 = vector.load %arg3[%c0, %c0_0, %c0_1] : memref<1x4x256xf32, #tpu.memory_space<vmem>>, vector<1x4x256xf32>
    %1 = vector.shape_cast %0 : vector<1x4x256xf32> to vector<4x256xf32>
    %c0_2 = arith.constant 0 : index
    %c0_3 = arith.constant 0 : index
    %c0_4 = arith.constant 0 : index
    %2 = vector.load %arg4[%c0_2, %c0_3, %c0_4] : memref<1x1x256xf32, #tpu.memory_space<vmem>>, vector<1x1x256xf32>
    %3 = vector.shape_cast %2 : vector<1x1x256xf32> to vector<1x256xf32>
    %cst = arith.constant dense<0.000000e+00> : vector<4x4xf32>
    %4 = tpu.matmul %1, %1, %cst {dimension_numbers = #tpu.dot_dimension_numbers<[1], [1], [0], [0], [0, 0, 1, 0], [], []>} : vector<4x256xf32>, vector<4x256xf32>, vector<4x4xf32> -> vector<4x4xf32>
    %5 = vector.broadcast %3 : vector<1x256xf32> to vector<4x256xf32>
    %6 = arith.mulf %1, %5 : vector<4x256xf32>
    %cst_5 = arith.constant dense<0.000000e+00> : vector<4xf32>
    %7 = vector.multi_reduction <add>, %6, %cst_5 [1] : vector<4x256xf32> to vector<4xf32>
    %8 = vector.shape_cast %7 : vector<4xf32> to vector<4x1xf32>
    %cst_6 = arith.constant dense<0.000000e+00> : vector<4xf32>
    %9 = vector.multi_reduction <add>, %1, %cst_6 [1] : vector<4x256xf32> to vector<4xf32>
    %10 = vector.shape_cast %9 : vector<4xf32> to vector<4x1xf32>
    %11 = arith.mulf %3, %3 : vector<1x256xf32>
    %cst_7 = arith.constant dense<0.000000e+00> : vector<1xf32>
    %12 = vector.multi_reduction <add>, %11, %cst_7 [1] : vector<1x256xf32> to vector<1xf32>
    %13 = vector.shape_cast %12 : vector<1xf32> to vector<1x1xf32>
    %cst_8 = arith.constant dense<0.000000e+00> : vector<1xf32>
    %14 = vector.multi_reduction <add>, %3, %cst_8 [1] : vector<1x256xf32> to vector<1xf32>
    %15 = vector.shape_cast %14 : vector<1xf32> to vector<1x1xf32>
    %c0_i32 = arith.constant 0 : i32
    %16 = arith.cmpi eq, %arg2, %c0_i32 : i32
    %17 = arith.extui %16 : i1 to i32
    %c0_i32_9 = arith.constant 0 : i32
    %18 = arith.cmpi ne, %17, %c0_i32_9 : i32
    scf.if %18 {
      %cst_50 = arith.constant 0.000000e+00 : f32
      %49 = vector.broadcast %cst_50 : f32 to vector<1x1x4x4xf32>
      %c0_51 = arith.constant 0 : index
      %c0_52 = arith.constant 0 : index
      %c0_53 = arith.constant 0 : index
      %c0_54 = arith.constant 0 : index
      %50 = vector.load %arg5[%c0_51, %c0_52, %c0_53, %c0_54] : memref<1x1x4x4xf32, #tpu.memory_space<vmem>>, vector<1x1x4x4xf32>
      tpu.vector_store %arg5[%c0_51, %c0_52, %c0_53, %c0_54], %49 {strides = array<i32>} : memref<1x1x4x4xf32, #tpu.memory_space<vmem>>, vector<1x1x4x4xf32>,
      %cst_55 = arith.constant 0.000000e+00 : f32
      %51 = vector.broadcast %cst_55 : f32 to vector<1x1x4x1xf32>
      %c0_56 = arith.constant 0 : index
      %c0_57 = arith.constant 0 : index
      %c0_58 = arith.constant 0 : index
      %c0_59 = arith.constant 0 : index
      %52 = vector.load %arg6[%c0_56, %c0_57, %c0_58, %c0_59] : memref<1x1x4x1xf32, #tpu.memory_space<vmem>>, vector<1x1x4x1xf32>
      tpu.vector_store %arg6[%c0_56, %c0_57, %c0_58, %c0_59], %51 {strides = array<i32>} : memref<1x1x4x1xf32, #tpu.memory_space<vmem>>, vector<1x1x4x1xf32>,
      %cst_60 = arith.constant 0.000000e+00 : f32
      %53 = vector.broadcast %cst_60 : f32 to vector<1x1x4x1xf32>
      %c0_61 = arith.constant 0 : index
      %c0_62 = arith.constant 0 : index
      %c0_63 = arith.constant 0 : index
      %c0_64 = arith.constant 0 : index
      %54 = vector.load %arg7[%c0_61, %c0_62, %c0_63, %c0_64] : memref<1x1x4x1xf32, #tpu.memory_space<vmem>>, vector<1x1x4x1xf32>
      tpu.vector_store %arg7[%c0_61, %c0_62, %c0_63, %c0_64], %53 {strides = array<i32>} : memref<1x1x4x1xf32, #tpu.memory_space<vmem>>, vector<1x1x4x1xf32>,
      %cst_65 = arith.constant 0.000000e+00 : f32
      %55 = vector.broadcast %cst_65 : f32 to vector<1x1x1x1xf32>
      %c0_66 = arith.constant 0 : index
      %c0_67 = arith.constant 0 : index
      %c0_68 = arith.constant 0 : index
      %c0_69 = arith.constant 0 : index
      %56 = vector.load %arg8[%c0_66, %c0_67, %c0_68, %c0_69] : memref<1x1x1x1xf32, #tpu.memory_space<vmem>>, vector<1x1x1x1xf32>
      tpu.vector_store %arg8[%c0_66, %c0_67, %c0_68, %c0_69], %55 {strides = array<i32>} : memref<1x1x1x1xf32, #tpu.memory_space<vmem>>, vector<1x1x1x1xf32>,
      %cst_70 = arith.constant 0.000000e+00 : f32
      %57 = vector.broadcast %cst_70 : f32 to vector<1x1x1x1xf32>
      %c0_71 = arith.constant 0 : index
      %c0_72 = arith.constant 0 : index
      %c0_73 = arith.constant 0 : index
      %c0_74 = arith.constant 0 : index
      %58 = vector.load %arg9[%c0_71, %c0_72, %c0_73, %c0_74] : memref<1x1x1x1xf32, #tpu.memory_space<vmem>>, vector<1x1x1x1xf32>
      tpu.vector_store %arg9[%c0_71, %c0_72, %c0_73, %c0_74], %57 {strides = array<i32>} : memref<1x1x1x1xf32, #tpu.memory_space<vmem>>, vector<1x1x1x1xf32>,
    } else {
    }
    %c0_10 = arith.constant 0 : index
    %c0_11 = arith.constant 0 : index
    %c0_12 = arith.constant 0 : index
    %c0_13 = arith.constant 0 : index
    %19 = vector.load %arg5[%c0_10, %c0_11, %c0_12, %c0_13] : memref<1x1x4x4xf32, #tpu.memory_space<vmem>>, vector<1x1x4x4xf32>
    %20 = vector.shape_cast %19 : vector<1x1x4x4xf32> to vector<4x4xf32>
    %21 = arith.addf %20, %4 : vector<4x4xf32>
    %c0_14 = arith.constant 0 : index
    %c0_15 = arith.constant 0 : index
    %c0_16 = arith.constant 0 : index
    %c0_17 = arith.constant 0 : index
    %22 = vector.load %arg5[%c0_14, %c0_15, %c0_16, %c0_17] : memref<1x1x4x4xf32, #tpu.memory_space<vmem>>, vector<1x1x4x4xf32>
    %23 = vector.shape_cast %22 : vector<1x1x4x4xf32> to vector<4x4xf32>
    %24 = vector.shape_cast %21 : vector<4x4xf32> to vector<1x1x4x4xf32>
    tpu.vector_store %arg5[%c0_14, %c0_15, %c0_16, %c0_17], %24 {strides = array<i32>} : memref<1x1x4x4xf32, #tpu.memory_space<vmem>>, vector<1x1x4x4xf32>,
    %c0_18 = arith.constant 0 : index
    %c0_19 = arith.constant 0 : index
    %c0_20 = arith.constant 0 : index
    %c0_21 = arith.constant 0 : index
    %25 = vector.load %arg6[%c0_18, %c0_19, %c0_20, %c0_21] : memref<1x1x4x1xf32, #tpu.memory_space<vmem>>, vector<1x1x4x1xf32>
    %26 = vector.shape_cast %25 : vector<1x1x4x1xf32> to vector<4x1xf32>
    %27 = arith.addf %26, %8 : vector<4x1xf32>
    %c0_22 = arith.constant 0 : index
    %c0_23 = arith.constant 0 : index
    %c0_24 = arith.constant 0 : index
    %c0_25 = arith.constant 0 : index
    %28 = vector.load %arg6[%c0_22, %c0_23, %c0_24, %c0_25] : memref<1x1x4x1xf32, #tpu.memory_space<vmem>>, vector<1x1x4x1xf32>
    %29 = vector.shape_cast %28 : vector<1x1x4x1xf32> to vector<4x1xf32>
    %30 = vector.shape_cast %27 : vector<4x1xf32> to vector<1x1x4x1xf32>
    tpu.vector_store %arg6[%c0_22, %c0_23, %c0_24, %c0_25], %30 {strides = array<i32>} : memref<1x1x4x1xf32, #tpu.memory_space<vmem>>, vector<1x1x4x1xf32>,
    %c0_26 = arith.constant 0 : index
    %c0_27 = arith.constant 0 : index
    %c0_28 = arith.constant 0 : index
    %c0_29 = arith.constant 0 : index
    %31 = vector.load %arg7[%c0_26, %c0_27, %c0_28, %c0_29] : memref<1x1x4x1xf32, #tpu.memory_space<vmem>>, vector<1x1x4x1xf32>
    %32 = vector.shape_cast %31 : vector<1x1x4x1xf32> to vector<4x1xf32>
    %33 = arith.addf %32, %10 : vector<4x1xf32>
    %c0_30 = arith.constant 0 : index
    %c0_31 = arith.constant 0 : index
    %c0_32 = arith.constant 0 : index
    %c0_33 = arith.constant 0 : index
    %34 = vector.load %arg7[%c0_30, %c0_31, %c0_32, %c0_33] : memref<1x1x4x1xf32, #tpu.memory_space<vmem>>, vector<1x1x4x1xf32>
    %35 = vector.shape_cast %34 : vector<1x1x4x1xf32> to vector<4x1xf32>
    %36 = vector.shape_cast %33 : vector<4x1xf32> to vector<1x1x4x1xf32>
    tpu.vector_store %arg7[%c0_30, %c0_31, %c0_32, %c0_33], %36 {strides = array<i32>} : memref<1x1x4x1xf32, #tpu.memory_space<vmem>>, vector<1x1x4x1xf32>,
    %c0_34 = arith.constant 0 : index
    %c0_35 = arith.constant 0 : index
    %c0_36 = arith.constant 0 : index
    %c0_37 = arith.constant 0 : index
    %37 = vector.load %arg8[%c0_34, %c0_35, %c0_36, %c0_37] : memref<1x1x1x1xf32, #tpu.memory_space<vmem>>, vector<1x1x1x1xf32>
    %38 = vector.shape_cast %37 : vector<1x1x1x1xf32> to vector<1x1xf32>
    %39 = arith.addf %38, %13 : vector<1x1xf32>
    %c0_38 = arith.constant 0 : index
    %c0_39 = arith.constant 0 : index
    %c0_40 = arith.constant 0 : index
    %c0_41 = arith.constant 0 : index
    %40 = vector.load %arg8[%c0_38, %c0_39, %c0_40, %c0_41] : memref<1x1x1x1xf32, #tpu.memory_space<vmem>>, vector<1x1x1x1xf32>
    %41 = vector.shape_cast %40 : vector<1x1x1x1xf32> to vector<1x1xf32>
    %42 = vector.shape_cast %39 : vector<1x1xf32> to vector<1x1x1x1xf32>
    tpu.vector_store %arg8[%c0_38, %c0_39, %c0_40, %c0_41], %42 {strides = array<i32>} : memref<1x1x1x1xf32, #tpu.memory_space<vmem>>, vector<1x1x1x1xf32>,
    %c0_42 = arith.constant 0 : index
    %c0_43 = arith.constant 0 : index
    %c0_44 = arith.constant 0 : index
    %c0_45 = arith.constant 0 : index
    %43 = vector.load %arg9[%c0_42, %c0_43, %c0_44, %c0_45] : memref<1x1x1x1xf32, #tpu.memory_space<vmem>>, vector<1x1x1x1xf32>
    %44 = vector.shape_cast %43 : vector<1x1x1x1xf32> to vector<1x1xf32>
    %45 = arith.addf %44, %15 : vector<1x1xf32>
    %c0_46 = arith.constant 0 : index
    %c0_47 = arith.constant 0 : index
    %c0_48 = arith.constant 0 : index
    %c0_49 = arith.constant 0 : index
    %46 = vector.load %arg9[%c0_46, %c0_47, %c0_48, %c0_49] : memref<1x1x1x1xf32, #tpu.memory_space<vmem>>, vector<1x1x1x1xf32>
    %47 = vector.shape_cast %46 : vector<1x1x1x1xf32> to vector<1x1xf32>
    %48 = vector.shape_cast %45 : vector<1x1xf32> to vector<1x1x1x1xf32>
    tpu.vector_store %arg9[%c0_46, %c0_47, %c0_48, %c0_49], %48 {strides = array<i32>} : memref<1x1x1x1xf32, #tpu.memory_space<vmem>>, vector<1x1x1x1xf32>,
    return
  }
  func.func @transform_0(%arg0: i32, %arg1: i32, %arg2: i32) -> (i32, i32, i32) {
    %c1_i32 = arith.constant 1 : i32
    %0 = arith.muli %arg1, %c1_i32 : i32
    %1 = arith.addi %0, %arg2 : i32
    %c0_i32 = arith.constant 0 : i32
    %c0_i32_0 = arith.constant 0 : i32
    return %arg0, %c0_i32, %1 : i32, i32, i32
  }
  func.func @transform_1(%arg0: i32, %arg1: i32, %arg2: i32) -> (i32, i32, i32) {
    %c1_i32 = arith.constant 1 : i32
    %0 = arith.muli %arg1, %c1_i32 : i32
    %1 = arith.addi %0, %arg2 : i32
    %c0_i32 = arith.constant 0 : i32
    %c0_i32_0 = arith.constant 0 : i32
    return %arg0, %c0_i32, %1 : i32, i32, i32
  }
  func.func @transform_2(%arg0: i32, %arg1: i32, %arg2: i32) -> (i32, i32, i32, i32) {
    %c0_i32 = arith.constant 0 : i32
    %c0_i32_0 = arith.constant 0 : i32
    %c0_i32_1 = arith.constant 0 : i32
    return %arg0, %arg1, %c0_i32, %c0_i32_0 : i32, i32, i32, i32
  }
  func.func @transform_3(%arg0: i32, %arg1: i32, %arg2: i32) -> (i32, i32, i32, i32) {
    %c0_i32 = arith.constant 0 : i32
    %c0_i32_0 = arith.constant 0 : i32
    %c0_i32_1 = arith.constant 0 : i32
    return %arg0, %arg1, %c0_i32, %c0_i32_0 : i32, i32, i32, i32
  }
  func.func @transform_4(%arg0: i32, %arg1: i32, %arg2: i32) -> (i32, i32, i32, i32) {
    %c0_i32 = arith.constant 0 : i32
    %c0_i32_0 = arith.constant 0 : i32
    %c0_i32_1 = arith.constant 0 : i32
    return %arg0, %arg1, %c0_i32, %c0_i32_0 : i32, i32, i32, i32
  }
  func.func @transform_5(%arg0: i32, %arg1: i32, %arg2: i32) -> (i32, i32, i32, i32) {
    %c0_i32 = arith.constant 0 : i32
    %c0_i32_0 = arith.constant 0 : i32
    %c0_i32_1 = arith.constant 0 : i32
    return %arg0, %arg1, %c0_i32, %c0_i32_0 : i32, i32, i32, i32
  }
  func.func @transform_6(%arg0: i32, %arg1: i32, %arg2: i32) -> (i32, i32, i32, i32) {
    %c0_i32 = arith.constant 0 : i32
    %c0_i32_0 = arith.constant 0 : i32
    %c0_i32_1 = arith.constant 0 : i32
    return %arg0, %arg1, %c0_i32, %c0_i32_0 : i32, i32, i32, i32
  }
}

</mosaic_0001>

<bundles_post_ra>
// kernel: tpu_custom_call.1
= control target key start
LH: loop header
LB: loop body
LE: loop exit
PB: predicated region body
PF: predicated region fallthrough
CT: control target
= control target key end

     0   :  { %s1384_s0 = inlined_call_operand.hbm [shape: f32[2,4,256], index: 0, kind: input, shape index: {}]   ;;  %s1385_s1 = inlined_call_operand.hbm [shape: f32[2,1,256], index: 1, kind: input, shape index: {}]   ;;  %s1386_s2 = inlined_call_operand.hbm [shape: f32[2,1,4,4], index: 2, kind: output, shape index: {0}]   ;;  %s1387_s3 = inlined_call_operand.vmem [shape: f32[2,1,4,1], index: 3, kind: output, shape index: {1}]   ;;  %s1388_s4 = inlined_call_operand.vmem [shape: f32[2,1,4,1], index: 4, kind: output, shape index: {2}]   ;;  %s1389_s5 = inlined_call_operand.vmem [shape: f32[2,1,1,1], index: 5, kind: output, shape index: {3}]   ;;  %s1390_s6 = inlined_call_operand.vmem [shape: f32[2,1,1,1], index: 6, kind: output, shape index: {4}]  }
   0x1   :  { %1393 = sst [smem:[#allocation11_spill]] %s1384_s0 }
   0x2   :  { %12 = vsyncpa [#allocation3], 0 }
   0x3   :  { %14 = vsyncpa [#allocation3 + $0x1], 0 }
   0x4   :  { %15 = vsyncpa [#allocation6], 0 }
   0x5   :  { %17 = vsyncpa [#allocation6 + $0x1], 0 }
   0x6   :  { %18 = vsyncpa [#allocation4], 0 }
   0x7   :  { %20 = vsyncpa [#allocation4 + $0x1], 0  ;;  %s1128_s21 = smov 0   ;;  %s1130_s22 = smov 0  }
   0x8   :  { %s1132_s23 = smov 0   ;;  %s1134_s24 = smov 0  }
   0x9   :  { %s1136_s25 = smov 0   ;;  %s1138_s26 = smov 0  }
   0xa LB: > { %s850_s27 = sadd.s32 4294967295, %s1087_s26   ;;  %s851_s28 = sadd.s32 4294967294, %s1087_s26   ;;  %s1087_s26 = sphi %s1138_s26, %s26_s26   ;;  %s1083_s25 = sphi %s1136_s25, %s1412_s25   ;;  %s1079_s24 = sphi %s1134_s24, %s1411_s24   ;;  %s1075_s23 = sphi %s1132_s23, %s1410_s23   ;;  %s1071_s22 = sphi %s1130_s22, %s1409_s22   ;;  %s1067_s21 = sphi %s1128_s21, %s1408_s21  }
   0xb   : > { %s45_s29 = sadd.s32 1, %s1083_s25  ;;  %s56_s30 = sadd.s32 1, %s1075_s23 }
   0xc   : > { %p47_p0 = scmp.ge.s32.totalorder %s45_s29, 2  ;;  %p63_p1 = scmp.ne.s32.totalorder %s1075_s23, %s1071_s22 }
   0xd   : > { %p64_p2 = scmp.eq.s32.totalorder %s1087_s26, 0  ;;  %p69_p3 = scmp.ne.s32.totalorder %s1071_s22, %s1067_s21 }
   0xe   : > { %s1414_s29 = smov (%p47_p0, %s45_s29), 0  ;;  %p70_p5 = scmp.eq.s32.totalorder %s850_s27, 0 }
   0xf   : > { %p1169_p4 = por %p64_p2, %p63_p1  ;;  %s51_s8 = ssub.s32 %s1083_s25, %s1414_s29 }
  0x10   : > { %p125_p6 = scmp.eq.s32.totalorder %s850_s27, 1  ;;  %p54_p7 = scmp.eq.s32.totalorder %s51_s8, 0 }
  0x11   : > { %p1175_p8 = por %p70_p5, %p69_p3  ;;  %p131_p10 = scmp.eq.s32.totalorder %s851_s28, 1 }
  0x12   : > { %p1179_p9 = por %p125_p6, %p63_p1  ;;  %p889_p13 = scmp.lt.s32.totalorder %s1087_s26, 2 }
  0x13   : > { %s1395_s9 = scalar_select %p1175_p8, 1, 0 }
  0x14   : > { %s1396_s10 = scalar_select %p1179_p9, 1, 0 }
  0x15   : > { %s1184_s11 = scalar_select %p54_p7, %s1075_s23, %s56_s30  }
  0x16   : > { %p1186_p11 = por %p131_p10, %p69_p3  ;;  %s1193_s13 = sand.u32 1, %s1075_s23  }
  0x17   : > { %s854_s14 = sshll.u32 %s1193_s13, 3  ;;  %s870_s15 = sshll.u32 %s1083_s25, 7 }
  0x18   : > { %s1397_s12 = scalar_select %p1186_p11, 1, 0 }
  0x19   : > { %s1398_s0 = sld [smem:[#allocation11_spill]]  ;;  %s267_s19 = scalar_lea.vmem [#allocation2], %s854_s14 }
  0x1a   : > { %s278_s20 = sshll.u32 %s267_s19, 4  ;;  %p1206_p0 = pnand %p889_p13, %p1169_p4  ;;  %s1202_s20 = int_to_ptr.vmem [resolvable:$true] %s278_s20 }
  0x1b   : > { %s264_s28 = scalar_lea.sflag [#allocation3], %s1193_s13 }
  0x1c   : > { %p943_p5 = pneg %p1206_p0 }
  0x1f   : > { %s1200_s18 = scalar_lea.hbm %s1398_s0, %s870_s15  ;;  %s946_s7 = scalar_lea.hbm %s1398_s0, 256 }
  0x20   : > { %s941_s30 = scalar_lea.hbm %s1200_s18, 128  ;;  %p947_p4 = scmp.lt.u32.totalorder %s1200_s18, %s1398_s0 }
  0x21   : > { %p942_p3 = scmp.ne.s32.totalorder %s1200_s18, %s941_s30  ;;  %p948_p10 = scmp.lt.u32.totalorder %s946_s7, %s941_s30 }
  0x22   : > { %p950_p12 = scmp.lt.u32.totalorder %s941_s30, %s1200_s18 }
  0x23   : > { %p944_p6 = pnand %p943_p5, %p942_p3  ;;  %p949_p13 = por %p948_p10, %p947_p4 }
  0x25   : > { %p945_p7 = pneg %p944_p6  ;;  %p951_p1 = por %p950_p12, %p949_p13 }
  0x27   : > { %p952_p2 = pnand %p951_p1, %p945_p7 }
  0x29   : > { %955 = shalt.err (!%p952_p2)
}
  0x2a   : > { %s956_s17 = scalar_lea.vmem %s1202_s20, 128  ;;  %s1089_s19 = smov [#allocation2]  }
  0x2b   : > { %p957_p3 = scmp.ne.s32.totalorder %s1202_s20, %s956_s17  ;;  %s961_s8 = sshll.u32 %s1089_s19, 4  ;;  %s962_s8 = int_to_ptr.vmem [resolvable:$false] %s961_s8 }
  0x2c   : > { %s963_s14 = scalar_lea.vmem %s962_s8, 256  ;;  %p964_p9 = scmp.lt.s32.totalorder %s1202_s20, %s962_s8 }
  0x2d   : > { %p959_p6 = pnand %p957_p3, %p943_p5  ;;  %p965_p4 = scmp.lt.s32.totalorder %s963_s14, %s956_s17 }
  0x2f   : > { %p960_p11 = pneg %p959_p6  ;;  %p966_p10 = por %p965_p4, %p964_p9 }
  0x31   : > { %p967_p12 = pnand %p966_p10, %p960_p11 }
  0x33   : > { %970 = shalt.err (!%p967_p12)
}
  0x34   : > { %881 = dma.hbm_to_vmem [thread:$0]  (!%p1206_p0), %s1200_s18, 128, %s1202_s20, %s264_s28  }
  0x35   : > { %p1400_p1 = scmp.lt.s32.totalorder %s1087_s26, 3  ;;  %p1401_p2 = scmp.ge.s32.totalorder %s1087_s26, 1 }
  0x36   : > { %s857_s7 = sshll.u32 %s1193_s13, 1  ;;  %s871_s15 = sshll.u32 %s1083_s25, 5 }
  0x37   : > { %p1242_p7 = pnand %p1401_p2, %p1400_p1  ;;  %s1251_s19 = scalar_lea.hbm %s1385_s1, %s871_s15 }
  0x38   : > { %s289_s8 = scalar_lea.vmem [#allocation5], %s857_s7  ;;  %s286_s18 = scalar_lea.sflag [#allocation6], %s1193_s13 }
  0x39   : > { %s1402_s30 = scalar_select %p1242_p7, 1, 0 }
  0x3a   : > { %s300_s14 = sshll.u32 %s289_s8, 4  ;;  %s971_s20 = scalar_lea.hbm %s1251_s19, 32  ;;  %s301_s14 = int_to_ptr.vmem [resolvable:$true] %s300_s14 }
  0x3b   : > { %p972_p9 = scmp.ne.s32.totalorder %s1251_s19, %s971_s20  ;;  %s976_s16 = scalar_lea.hbm %s1385_s1, 64 }
  0x3c   : > { %p977_p3 = scmp.lt.u32.totalorder %s1251_s19, %s1385_s1  ;;  %p978_p6 = scmp.lt.u32.totalorder %s976_s16, %s971_s20 }
  0x3d   : > { %p974_p11 = pnand %p972_p9, %p943_p5  ;;  %p980_p10 = scmp.lt.u32.totalorder %s971_s20, %s1251_s19 }
  0x3e   : > { %p979_p4 = por %p978_p6, %p977_p3 }
  0x3f   : > { %p975_p13 = pneg %p974_p11 }
  0x40   : > { %p981_p12 = por %p980_p10, %p979_p4 }
  0x42   : > { %p982_p1 = pnand %p981_p12, %p975_p13 }
  0x44   : > { %985 = shalt.err (!%p982_p1)
}
  0x45   : > { %s986_s13 = scalar_lea.vmem %s301_s14, 32  ;;  %s1090_s7 = smov [#allocation5]  }
  0x46   : > { %p987_p2 = scmp.ne.s32.totalorder %s301_s14, %s986_s13  ;;  %s991_s0 = sshll.u32 %s1090_s7, 4  ;;  %s992_s0 = int_to_ptr.vmem [resolvable:$false] %s991_s0 }
  0x47   : > { %s993_s8 = scalar_lea.vmem %s992_s0, 64  ;;  %p994_p8 = scmp.lt.s32.totalorder %s301_s14, %s992_s0 }
  0x48   : > { %p989_p9 = pnand %p987_p2, %p943_p5  ;;  %p995_p7 = scmp.lt.s32.totalorder %s993_s8, %s986_s13 }
  0x4a   : > { %p990_p11 = pneg %p989_p9  ;;  %p996_p3 = por %p995_p7, %p994_p8 }
  0x4c   : > { %p997_p6 = pnand %p996_p3, %p990_p11 }
  0x4e   : > { %1000 = shalt.err (!%p997_p6)
}
  0x4f   : > { %884 = dma.hbm_to_vmem [thread:$0]  (!%p1206_p0), %s1251_s19, 32, %s301_s14, %s286_s18  }
  0x50   : > { %p1403_p13 = scmp.ne.s32.totalorder %s1402_s30, 0 }
  0x51   : > { %s1276_s20 = sand.u32 (!%p1403_p13), 1, %s1071_s22   ;;  %p1404_p5 = scmp.ne.s32.totalorder (!%p1403_p13), %s1395_s9, 0 }
  0x52   : > { %309 = sbr.rel (%p1403_p13) target bundleno = 328 (0x148), region = 28  ;;  %s861_s28 = sshll.u32 (!%p1403_p13), %s1276_s20, 3 }
  0x53   : > { %s312_s16 = scalar_lea.sflag (!%p1403_p13), [#allocation3], %s1276_s20  ;;  %s315_s15 = scalar_lea.vmem (!%p1403_p13), [#allocation2], %s861_s28 }
  0x59   : > { %1054 = dma.done.wait (%p1404_p5), %s312_s16, 128  }
  0x5a   : > { %1056 = vsyncadd (%p1404_p5), %s312_s16, 4294967168  ;;  %s862_s27 = sshll.u32 %s1276_s20, 1  ;;  %s321_s30 = scalar_lea.sflag [#allocation6], %s1276_s20 }
  0x5b   : > { %s324_s19 = scalar_lea.vmem [#allocation5], %s862_s27 }
  0x5c   : > { %1058 = dma.done.wait (%p1404_p5), %s321_s30, 32  }
  0x5d   : > { %1060 = vsyncadd (%p1404_p5), %s321_s30, 4294967264  ;;  %v490_v0 = vlaneseq  ;;  %p388_p8 = scmp.lt.s32.totalorder %s1079_s24, 1  ;;  %vm549_vm0 = vcmask 0   ;;  %v1091_v4 = vmov 0.0   ;;  %v414_v5 = vld [vmem:[%s315_s15] sm:$0xff]  ;;  %vm527_vm1 = vcmask 1040384  }
  0x5e   : > { %v415_v6 = vld [vmem:[%s324_s19] sm:$0x3]  ;;  %v417_v7 = vcombine.high %v414_v5, %v414_v5  ;;  %vm504_vm2 = vcmask 1043456   ;;  %vm546_vm3 = vcmask 3072   ;;  %s863_s28 = sshll.u32 %s1276_s20, 2  ;;  %vm544_vm4 = vcmask 27648  }
  0x5f   : > { %v491_v1 = vshrl.u32 %v490_v0, 7  ;;  %s1292_s14 = scalar_select %p388_p8, %s1079_s24, 1  ;;  %v515_v8 = vmul.f32 %v415_v6, %v415_v6  ;;  %v510_v24 = vsel %vm504_vm2, %v414_v5, 0.0 }
  0x60   : > { %419 = vmatprep.subr.mxu0 %v417_v7  ;;  %483 = vmatprep.mubr.f32.mxu0 %v417_v7  ;;  %v511_v25 = vsel %vm504_vm2, %v417_v7, 0.0  ;;  %s1308_s16 = scalar_lea.vmem [#allocation7], %s863_s28  ;;  %p1405_p7 = scmp.ne.s32.totalorder %s1396_s10, 0 }
  0x61   : > { %v492_v2 = vsub.s32 0, %v491_v1  ;;  %v496_v3 = vsub.s32 1, %v491_v1  ;;  %s1298_s13 = scalar_lea.vmem %s1389_s5, %s1292_s14  ;;  %420 = vmatpush1.xpose.msra.mxu0 %v414_v5  ;;  %v512_v27 = vadd.f32 %v511_v25, %v510_v24  ;;  %s864_s9 = sshll.u32 %s1292_s14, 2  ;;  %545 = vst.msk [vmem:[%s1308_s16] sm:$0xf] %vm544_vm4, %v1091_v4 }
  0x62   : > { %550 = vst.msk [vmem:[%s1298_s13] sm:$0x1] %vm549_vm0, %v1091_v4  ;;  %s394_s8 = scalar_lea.vmem %s1387_s3, %s864_s9  ;;  %s413_s30 = scalar_lea.vmem %s1390_s6, %s1292_s14 }
  0x63   : > { %v493_v9 = vrot.slane %v415_v6, %v492_v2  ;;  %v497_v10 = vrot.slane %v415_v6, %v496_v3  ;;  %v520_v11 = vrot.slane %v515_v8, %v492_v2  ;;  %v524_v12 = vrot.slane %v515_v8, %v496_v3  ;;  %547 = vst.msk [vmem:[%s394_s8] sm:$0xf] %vm546_vm3, %v1091_v4  ;;  %s401_s17 = scalar_lea.vmem %s1388_s4, %s864_s9  ;;  %s867_s14 = sshll.u32 %s1079_s24, 6 }
  0x64   : > { %484 = vmatmul.mubr.f32.vlgmr.msra.gmra.mrb[0].mxu0 %v414_v5  ;;  %551 = vst.msk [vmem:[%s413_s30] sm:$0x1] %vm549_vm0, %v1091_v4  ;;  %s611_s9 = sshll.u32 %s1308_s16, 4  ;;  %s1333_s0 = scalar_lea.hbm %s1386_s2, %s867_s14  ;;  %s1335_s9 = int_to_ptr.vmem [resolvable:$true] %s611_s9 }
  0x65   : > { %v498_v13 = vcombine.low %v493_v9, %v497_v10  ;;  %v535_v14 = vsel %vm527_vm1, %v493_v9, 0.0  ;;  %v528_v15 = vsel %vm527_vm1, %v520_v11, 0.0  ;;  %v529_v16 = vsel %vm527_vm1, %v524_v12, 0.0  ;;  %548 = vst.msk [vmem:[%s401_s17] sm:$0xf] %vm546_vm3, %v1091_v4  ;;  %s1001_s28 = scalar_lea.vmem %s1335_s9, 64 }
  0x66   : > { %v536_v18 = vsel %vm527_vm1, %v497_v10, 0.0  ;;  %v530_v19 = vadd.f32 %v529_v16, %v528_v15  ;;  %p1002_p0 = scmp.ne.s32.totalorder %s1335_s9, %s1001_s28  ;;  %s1092_s24 = smov [#allocation7]  }
  0x67   : > { %v500_v17 = vmul.f32 %v498_v13, %v414_v5  ;;  %v537_v22 = vadd.f32 %v536_v18, %v535_v14  ;;  %s1005_s15 = sshll.u32 %s1092_s24, 4  ;;  %s1006_s15 = int_to_ptr.vmem [resolvable:$false] %s1005_s15 }
  0x68   : > { %531 = vadd.xlane.f32.xlu1 %v530_v19  ;;  %v552_v40 = vld [vmem:[%s1308_s16] sm:$0xf]  ;;  %p1003_p4 = pnand %p1002_p0, %p1405_p7  ;;  %s1007_s27 = scalar_lea.vmem %s1006_s15, 128 }
  0x69   : > { %v502_v20 = vcombine.high %v500_v17, %v500_v17  ;;  %v505_v21 = vsel %vm504_vm2, %v500_v17, 0.0  ;;  %v563_v28 = vld [vmem:[%s1298_s13] sm:$0x1]  ;;  %p1008_p12 = scmp.lt.s32.totalorder %s1335_s9, %s1006_s15  ;;  %p1009_p1 = scmp.lt.s32.totalorder %s1007_s27, %s1001_s28 }
  0x6a   : > { %v556_v31 = vld [vmem:[%s394_s8] sm:$0xf]  ;;  %p1004_p10 = pneg %p1003_p4 }
  0x6b   : > { %v506_v23 = vsel %vm504_vm2, %v502_v20, 0.0  ;;  %v567_v32 = vld [vmem:[%s413_s30] sm:$0x1]  ;;  %p1010_p2 = por %p1009_p1, %p1008_p12 }
  0x6c   : > { %v507_v26 = vadd.f32 %v506_v23, %v505_v21  ;;  %538 = vadd.xlane.f32.xlu1 %v537_v22  ;;  %v560_v37 = vld [vmem:[%s401_s17] sm:$0xf] }
  0x6d   : > { %p1011_p9 = pnand %p1010_p2, %p1004_p10 }
  0x6e   : > { %508 = vadd.xlane.f32.xlu0 %v507_v26 }
  0x72   : > { %513 = vadd.xlane.f32.xlu0 %v512_v27 }
  0xf5   : > { %v532_v29 = vpop.xlane.xlu1 %531 }
  0xf6   : > { %v564_v30 = vadd.f32 %v563_v28, %v532_v29 }
  0xf8   : > { %566 = vst.msk [vmem:[%s1298_s13] sm:$0x1] %vm549_vm0, %v564_v30 }
  0xf9   : > { %v539_v34 = vpop.xlane.xlu1 %538 }
  0xfa   : > { %v568_v36 = vadd.f32 %v567_v32, %v539_v34 }
  0xfb   : > { %v509_v33 = vpop.xlane.xlu0 %508 }
  0xfc   : > { %v557_v35 = vadd.f32 %v556_v31, %v509_v33  ;;  %569 = vst.msk [vmem:[%s413_s30] sm:$0x1] %vm549_vm0, %v568_v36 }
  0xfe   : > { %559 = vst.msk [vmem:[%s394_s8] sm:$0xf] %vm546_vm3, %v557_v35  ;;  %s571_s8 = scalar_lea.sflag [#allocation4], %s1276_s20 }
  0xff   : > { %v514_v38 = vpop.xlane.xlu0 %513 }
 0x100   : > { %v561_v39 = vadd.f32 %v560_v37, %v514_v38 }
 0x102   : > { %562 = vst.msk [vmem:[%s401_s17] sm:$0xf] %vm546_vm3, %v561_v39 }
 0x137   : > { %v485_v41 = vpop.f32.mrb[0].mxu0 }
 0x138   : > { %v553_v42 = vadd.f32 %v552_v40, %v485_v41  ;;  %v487_v43 = vpop.f32.mrb[1].mxu0 }
 0x13a   : > { %555 = vst.msk [vmem:[%s1308_s16] sm:$0xf] %vm544_vm4, %v553_v42 }
 0x13b   : > { %1014 = shalt.err (!%p1011_p9)
}
 0x13c   : > { %s1015_s20 = scalar_lea.hbm %s1333_s0, 64  ;;  %s1019_s19 = scalar_lea.hbm %s1386_s2, 128 }
 0x13d   : > { %p1016_p11 = scmp.ne.s32.totalorder %s1333_s0, %s1015_s20  ;;  %p1020_p13 = scmp.lt.u32.totalorder %s1333_s0, %s1386_s2 }
 0x13e   : > { %p1021_p5 = scmp.lt.u32.totalorder %s1019_s19, %s1015_s20  ;;  %p1023_p0 = scmp.lt.u32.totalorder %s1015_s20, %s1333_s0 }
 0x13f   : > { %p1017_p3 = pnand %p1016_p11, %p1405_p7 }
 0x140   : > { %p1022_p8 = por %p1021_p5, %p1020_p13 }
 0x141   : > { %p1018_p6 = pneg %p1017_p3 }
 0x142   : > { %p1024_p4 = por %p1023_p0, %p1022_p8 }
 0x144   : > { %p1025_p10 = pnand %p1024_p4, %p1018_p6 }
 0x146   : > { %1028 = shalt.err (!%p1025_p10)
}
 0x147   : > { %876 = dma.vmem_to_hbm [thread:$0]  (%p1405_p7), %s1335_s9, 64, %s1333_s0, %s571_s8  }
 0x148 PF: > { %s635_s14 = sand.u32 1, %s1067_s21   ;;  %p1406_p12 = scmp.ne.s32.totalorder %s1397_s12, 0 }
 0x149   : > { %p1407_p1 = scmp.ge.s32.totalorder %s1087_s26, 2  ;;  %s636_s13 = scalar_lea.sflag [#allocation4], %s635_s14 }
 0x14b   : > { %p886_p2 = pnand %p1407_p1, %p1406_p12 }
 0x14d   : > { %1062 = dma.done.wait (!%p886_p2), %s636_s13, 64  }
 0x14e   : > { %1064 = vsyncadd (!%p886_p2), %s636_s13, 4294967232  ;;  %s26_s26 = sadd.s32 1, %s1087_s26   ;;  %s1408_s21 = smov %s1071_s22 }
 0x14f   : > { %p23_p9 = scmp.ge.s32.totalorder %s26_s26, 4   ;;  %s1409_s22 = smov %s1075_s23 }
 0x150   : > { %s1410_s23 = smov %s1184_s11  ;;  %s1411_s24 = smov %s1083_s25 }
 0x151   : > { %s1412_s25 = smov %s1414_s29  ;;  %25 = sbr.rel (!%p23_p9) target bundleno = 10 (0xa), region = 138 }
 0x158   :  { %679 = vsyncpa [#allocation3], 1 }
 0x159   :  { %681 = vsyncpa [#allocation3 + $0x1], 1 }
 0x15a   :  { %682 = vsyncpa [#allocation6], 1 }
 0x15b   :  { %684 = vsyncpa [#allocation6 + $0x1], 1 }
 0x15c   :  { %685 = vsyncpa [#allocation4], 1 }
 0x15d   :  { %687 = vsyncpa [#allocation4 + $0x1], 1 }

</bundles_post_ra>
